<compile_context>
chip_gen: v6e
topology: v6e:2x2x1
jax: 0.10.0
libtpu: 0.0.40
codegen_flags: <defaults>
</compile_context>

<pallas_src>
import functools
import math

import jax
import jax.numpy as jnp
from jax.experimental import pallas as pl
from jax.experimental.pallas import tpu as pltpu


def _round_up(x, m):
    return ((x + m - 1) // m) * m


def _pad2d(x, rows, cols):
    pr, pc = rows - x.shape[0], cols - x.shape[1]
    if pr or pc:
        x = jnp.pad(x, ((0, pr), (0, pc)))
    return x


def _pick_tiles(n):
    """Row tile tm and reduction tile tk, decoupled from N's divisibility."""
    n128 = _round_up(n, 128)
    # Row tile: prefer 512 (near HBM roofline), keep >=2 row tiles so the
    # "parallel" axis can shard across both v7x TensorCores, and cap the
    # zero-padding waste on streamed adjacency rows at ~25%.
    tm = 128
    for cand in (512, 256):
        padded = _round_up(n, cand)
        if cand <= n128 and padded // cand >= 2 and (padded - n128) * 4 <= n128:
            tm = cand
            break
    # Reduction tile (adj columns / support rows), independent of tm.
    tk = 128
    for cand in (512, 384, 256):
        padded = _round_up(n, cand)
        if cand <= n128 and (padded - n128) * 4 <= n128:
            tk = cand
            break
    return tm, tk


# ---------------- kernel 1: support = features @ weight (bf16 MXU) ----------
def _support_kernel(feat_ref, w_ref, out_ref):
    out_ref[...] = jnp.dot(
        feat_ref[...], w_ref[...], preferred_element_type=jnp.float32
    ).astype(out_ref.dtype)


# -------- kernel 2: out = relu((adj @ support) * row_scale), tiled ----------
def _spmm_kernel(scale_ref, adj_ref, sup_ref, out_ref, *, active: bool):
    k = pl.program_id(1)

    a = adj_ref[...]
    if a.dtype != sup_ref.dtype:
        # int8 0/1 mask -> bf16 (exact); conversion is VPU filler, MXU stays bf16.
        a = a.astype(jnp.float32).astype(sup_ref.dtype)
    part = jnp.dot(a, sup_ref[...], preferred_element_type=jnp.float32)

    # out_ref block index is (i, 0) for every k -> resident accumulator.
    @pl.when(k == 0)
    def _():
        out_ref[...] = part

    @pl.when(k > 0)
    def _():
        out_ref[...] += part

    @pl.when(k == pl.num_programs(1) - 1)
    def _():
        r = out_ref[...] * scale_ref[...]        # exact f32 per-row scale
        if active:
            r = jnp.maximum(r, 0.0)
        out_ref[...] = r


def gnn_layer_forward(features, adj, weight, active=True, *,
                      adj_row_scale=None,
                      mxu_dtype=jnp.bfloat16,
                      adj_mask_dtype=jnp.int8,
                      vmem_budget_bytes=40 * 1024 * 1024,
                      vmem_limit_bytes=48 * 1024 * 1024):
    """Pallas implementation of GNNLayer.forward.

    features:      [N, F_in]  float32
    adj:           [N, N]     dense adjacency.  If `adj_row_scale` is given,
                   `adj` is interpreted as a 0/1 connectivity mask (streamed
                   as int8) and the per-row normalization (e.g. 1/deg) is
                   applied exactly in f32 at the finalize step.  Otherwise the
                   adjacency values are streamed directly in bf16.
    adj_row_scale: optional [N] or [N, 1] float32 per-row scale.
    weight:        [F_in, F_out] float32
    returns:       [N, F_out] float32
    """
    n, f_in = features.shape
    f_out = weight.shape[1]

    f_in_p = _round_up(f_in, 128)
    f_out_p = _round_up(f_out, 128)

    tm, tk = _pick_tiles(n)
    n_rows_p = _round_up(n, tm)        # padded output / adjacency-row count
    n_cols_p = _round_up(n, tk)        # padded reduction / support-row count

    # Narrow dtypes BEFORE padding: no f32 N^2 intermediate in the wrapper.
    feat_p = _pad2d(features.astype(mxu_dtype), n_cols_p, f_in_p)
    w_p = _pad2d(weight.astype(mxu_dtype), f_in_p, f_out_p)
    if adj_row_scale is not None:
        adj_p = _pad2d(adj.astype(adj_mask_dtype), n_rows_p, n_cols_p)
        scale = jnp.asarray(adj_row_scale, jnp.float32).reshape(n, 1)
    else:
        adj_p = _pad2d(adj.astype(mxu_dtype), n_rows_p, n_cols_p)
        scale = jnp.ones((n, 1), jnp.float32)
    scale_p = _pad2d(scale, n_rows_p, 1)

    # ---------------- kernel 1: support = features @ weight -----------------
    tm1 = tk                                    # divides n_cols_p by construction
    support = pl.pallas_call(
        _support_kernel,
        out_shape=jax.ShapeDtypeStruct((n_cols_p, f_out_p), mxu_dtype),
        grid=(n_cols_p // tm1,),
        in_specs=[
            pl.BlockSpec((tm1, f_in_p), lambda i: (i, 0)),
            pl.BlockSpec((f_in_p, f_out_p), lambda i: (0, 0)),
        ],
        out_specs=pl.BlockSpec((tm1, f_out_p), lambda i: (i, 0)),
        compiler_params=pltpu.CompilerParams(
            dimension_semantics=("parallel",),
            vmem_limit_bytes=vmem_limit_bytes),
        cost_estimate=pl.CostEstimate(
            flops=2 * n_cols_p * f_in_p * f_out_p,
            transcendentals=0,
            bytes_accessed=int(feat_p.size * feat_p.dtype.itemsize
                               + w_p.size * w_p.dtype.itemsize
                               + n_cols_p * f_out_p * 2)),
    )(feat_p, w_p)

    # ------------- kernel 2: out = relu((adj @ support) * scale) ------------
    adj_isz = adj_p.dtype.itemsize
    sup_isz = support.dtype.itemsize
    # Keep the whole support matrix resident in VMEM when it fits the budget.
    resident_bytes = (2 * tm * tk * adj_isz            # adj tiles (double buf)
                      + 2 * n_cols_p * f_out_p * sup_isz   # resident support
                      + 2 * tm * f_out_p * 4               # output block
                      + 2 * tm * 4)                        # scale tile
    resident = resident_bytes <= vmem_budget_bytes
    if resident:
        sup_spec = pl.BlockSpec((n_cols_p, f_out_p), lambda i, k: (0, 0))
        sup_reads = 1
    else:
        sup_spec = pl.BlockSpec((tk, f_out_p), lambda i, k: (k, 0))
        sup_reads = n_rows_p // tm

    flops = 2 * n_rows_p * n_cols_p * f_out_p            # spmm flops only
    bytes_accessed = int(adj_p.size * adj_isz
                         + sup_reads * support.size * sup_isz
                         + n_rows_p * f_out_p * 4
                         + n_rows_p * 4)

    out_p = pl.pallas_call(
        functools.partial(_spmm_kernel, active=active),
        out_shape=jax.ShapeDtypeStruct((n_rows_p, f_out_p), jnp.float32),
        grid=(n_rows_p // tm, n_cols_p // tk),
        in_specs=[
            pl.BlockSpec((tm, 1), lambda i, k: (i, 0)),        # per-row scale
            pl.BlockSpec((tm, tk), lambda i, k: (i, k)),       # adjacency tile
            sup_spec,                                          # support
        ],
        out_specs=pl.BlockSpec((tm, f_out_p), lambda i, k: (i, 0)),
        compiler_params=pltpu.CompilerParams(
            dimension_semantics=("parallel", "arbitrary"),
            vmem_limit_bytes=vmem_limit_bytes),
        cost_estimate=pl.CostEstimate(
            flops=flops, transcendentals=0, bytes_accessed=bytes_accessed),
    )(scale_p, adj_p, support)

    return out_p[:n, :f_out]


def xavier_uniform(key, shape):
    # Matches torch.nn.init.xavier_uniform_ for a 2-D weight.
    fan_in, fan_out = shape
    bound = math.sqrt(6.0 / (fan_in + fan_out))
    return jax.random.uniform(key, shape, dtype=jnp.float32,
                              minval=-bound, maxval=bound)


if __name__ == "__main__":
    key = jax.random.PRNGKey(0)
    k_w, k_feat, k_adj = jax.random.split(key, 3)

    # Small shapes consistent with the module: N nodes, in/out feature dims.
    N, F_IN, F_OUT = 200, 64, 32

    weight = xavier_uniform(k_w, (F_IN, F_OUT))
    features = jax.random.normal(k_feat, (N, F_IN), dtype=jnp.float32)

    # Sparse-ish adjacency with self loops, represented exactly as a 0/1 mask
    # plus per-row 1/deg scale (SDCN-style row-normalized D^-1 (A + I)).
    raw = jax.random.uniform(k_adj, (N, N), dtype=jnp.float32)
    mask = jnp.logical_or(raw > 0.9, jnp.eye(N, dtype=bool)).astype(jnp.float32)
    deg = jnp.sum(mask, axis=1)
    row_scale = 1.0 / deg

    out = gnn_layer_forward(features, mask, weight, active=True,
                            adj_row_scale=row_scale)
    out = jax.block_until_ready(out)
    assert out.shape == (N, F_OUT)

    # Reference with matching bf16 casts on the MXU operands (f32 accumulate);
    # the 0/1 mask and the f32 1/deg post-scale are exact.
    f_bf = features.astype(jnp.bfloat16).astype(jnp.float32)
    w_bf = weight.astype(jnp.bfloat16).astype(jnp.float32)
    sup_ref = (f_bf @ w_bf).astype(jnp.bfloat16).astype(jnp.float32)
    ref = jnp.maximum((mask @ sup_ref) * row_scale[:, None], 0.0)
    err = float(jnp.max(jnp.abs(out - ref)))
    assert jnp.allclose(out, ref, atol=2e-2, rtol=2e-2), err

    print("KERNEL_OK")
</pallas_src>

<mosaic_0001>
module attributes {stable_mosaic.version = 11 : i64} {
  func.func @_support_kernel(%arg0: i32, %arg1: memref<256x128xbf16, #tpu.memory_space<vmem>>, %arg2: memref<128x128xbf16, #tpu.memory_space<vmem>>, %arg3: memref<256x128xbf16, #tpu.memory_space<vmem>>) attributes {dimension_semantics = [#tpu.dimension_semantics<parallel>], iteration_bounds = array<i64: 1>, scalar_prefetch = 0 : i64, scratch_operands = 0 : i64, tpu.core_type = #tpu.core_type<tc>, window_params = [{transform_indices = @transform_0, window_bounds = array<i64: 256, 128>}, {pipeline_mode = #tpu.pipeline_mode<synchronous>, transform_indices = @transform_1, window_bounds = array<i64: 128, 128>}, {transform_indices = @transform_2, window_bounds = array<i64: 256, 128>}]} {
    %c0 = arith.constant 0 : index
    %c0_0 = arith.constant 0 : index
    %0 = vector.load %arg1[%c0, %c0_0] : memref<256x128xbf16, #tpu.memory_space<vmem>>, vector<256x128xbf16>
    %c0_1 = arith.constant 0 : index
    %c0_2 = arith.constant 0 : index
    %1 = vector.load %arg2[%c0_1, %c0_2] : memref<128x128xbf16, #tpu.memory_space<vmem>>, vector<128x128xbf16>
    %cst = arith.constant dense<0.000000e+00> : vector<256x128xf32>
    %2 = tpu.matmul %0, %1, %cst {dimension_numbers = #tpu.dot_dimension_numbers<[1], [0], [0], [1], [0, 0, 1, 1], [], []>} : vector<256x128xbf16>, vector<128x128xbf16>, vector<256x128xf32> -> vector<256x128xf32>
    %3 = arith.truncf %2 : vector<256x128xf32> to vector<256x128xbf16>
    %c0_3 = arith.constant 0 : index
    %c0_4 = arith.constant 0 : index
    %4 = vector.load %arg3[%c0_3, %c0_4] : memref<256x128xbf16, #tpu.memory_space<vmem>>, vector<256x128xbf16>
    tpu.vector_store %arg3[%c0_3, %c0_4], %3 {strides = array<i32>} : memref<256x128xbf16, #tpu.memory_space<vmem>>, vector<256x128xbf16>,
    return
  }
  func.func @transform_0(%arg0: i32) -> (i32, i32) {
    %c0_i32 = arith.constant 0 : i32
    %c0_i32_0 = arith.constant 0 : i32
    return %arg0, %c0_i32 : i32, i32
  }
  func.func @transform_1(%arg0: i32) -> (i32, i32) {
    %c0_i32 = arith.constant 0 : i32
    %c0_i32_0 = arith.constant 0 : i32
    %c0_i32_1 = arith.constant 0 : i32
    return %c0_i32, %c0_i32_0 : i32, i32
  }
  func.func @transform_2(%arg0: i32) -> (i32, i32) {
    %c0_i32 = arith.constant 0 : i32
    %c0_i32_0 = arith.constant 0 : i32
    return %arg0, %c0_i32 : i32, i32
  }
}

</mosaic_0001>

<bundles_post_ra>
// kernel: tpu_custom_call.1
= control target key start
LH: loop header
LB: loop body
LE: loop exit
PB: predicated region body
PF: predicated region fallthrough
CT: control target
= control target key end

     0   :  { %7 = vsyncpa [#allocation3], 0  ;;  %s976_s0 = inlined_call_operand.hbm [shape: bf16[256,128], index: 0, kind: input, shape index: {}]   ;;  %s977_s1 = inlined_call_operand.hbm [shape: bf16[128,128], index: 1, kind: input, shape index: {}]   ;;  %s978_s2 = inlined_call_operand.hbm [shape: bf16[256,128], index: 2, kind: output, shape index: {}]  }
   0x1   :  { %8 = vsyncpa [#allocation6], 0 }
   0x2   :  { %9 = vsyncpa [#allocation4], 0  ;;  %s938_s9 = smov [#allocation2]  }
   0x3   :  { %s15_s10 = sshll.u32 %s938_s9, 4  ;;  %s16_s10 = int_to_ptr.vmem [resolvable:$true] %s15_s10 }
   0x4   :  { %s880_s11 = scalar_lea.vmem %s16_s10, 2048  ;;  %p885_p1 = scmp.lt.s32.totalorder %s16_s10, %s16_s10 }
   0x5   :  { %p881_p0 = scmp.ne.s32.totalorder %s16_s10, %s880_s11  ;;  %p886_p2 = scmp.lt.s32.totalorder %s880_s11, %s880_s11 }
   0x7   :  { %p887_p3 = por %p886_p2, %p885_p1 }
   0x9   :  { %p888_p4 = pnand %p887_p3, %p881_p0 }
   0xb   :  { %891 = shalt.err (!%p888_p4)
}
   0xc   :  { %s939_s12 = smov 64   ;;  %s940_s13 = smov 4  }
   0xd   :  { %21 = dma.hbm_to_vmem [thread:$0]  %s976_s0, 2048, %s16_s10, [#allocation3], %s939_s12, %s939_s12, %s940_s13  }
   0xe   :  { %s941_s16 = smov [#allocation5]  }
   0xf   :  { %s27_s17 = sshll.u32 %s941_s16, 4  ;;  %s28_s17 = int_to_ptr.vmem [resolvable:$true] %s27_s17 }
  0x10   :  { %s900_s18 = scalar_lea.vmem %s28_s17, 1024  ;;  %p905_p6 = scmp.lt.s32.totalorder %s28_s17, %s28_s17 }
  0x11   :  { %p901_p5 = scmp.ne.s32.totalorder %s28_s17, %s900_s18  ;;  %p906_p7 = scmp.lt.s32.totalorder %s900_s18, %s900_s18 }
  0x13   :  { %p907_p8 = por %p906_p7, %p905_p6 }
  0x15   :  { %p908_p9 = pnand %p907_p8, %p901_p5 }
  0x17   :  { %911 = shalt.err (!%p908_p9)
}
  0x18   :  { %33 = dma.hbm_to_vmem [thread:$0]  %s977_s1, 1024, %s28_s17, [#allocation6], %s939_s12, %s939_s12, %s940_s13  }
  0x19   :  { %932 = dma.done.wait [#allocation3], 2048  }
  0x1a   :  { %933 = vsyncadd [#allocation3], 4294965248 }
  0x1b   :  { %934 = dma.done.wait [#allocation6], 1024  }
  0x1c   :  { %935 = vsyncadd [#allocation6], 4294966272  ;;  %v848_v0 = vld [vmem:[#allocation5 + $0x38] sm:$0xff]   ;;  %v849_v1 = vld [vmem:[#allocation5 + $0x30] sm:$0xff]   ;;  %s942_s0 = smov [#allocation7]  }
  0x1d   :  { %779 = vmatprep.subr.bf16.mxu0 %v848_v0  ;;  %827 = vmatprep.subr.bf16.mxu1 %v848_v0  ;;  %v850_v2 = vld [vmem:[#allocation5 + $0x28] sm:$0xff]   ;;  %v851_v3 = vld [vmem:[#allocation5 + $0x20] sm:$0xff]   ;;  %v852_v6 = vld [vmem:[#allocation5 + $0x18] sm:$0xff]   ;;  %s559_s1 = sshll.u32 %s942_s0, 4  ;;  %s560_s1 = int_to_ptr.vmem [resolvable:$true] %s559_s1 }
  0x1e   :  { %780 = vmatpush3.bf16.msra.mxu0 %v848_v0  ;;  %835 = vmatpush3.bf16.msra.mxu1 %v848_v0  ;;  %v856_v4 = vld [vmem:[#allocation2] sm:$0xff]   ;;  %v853_v7 = vld [vmem:[#allocation5 + $0x10] sm:$0xff]   ;;  %v854_v8 = vld [vmem:[#allocation5 + $0x8] sm:$0xff]   ;;  %s912_s21 = scalar_lea.vmem %s560_s1, 2048  ;;  %p917_p11 = scmp.lt.s32.totalorder %s560_s1, %s560_s1 }
  0x1f   :  { %781 = vmatprep.subr.bf16.mxu0 %v849_v1  ;;  %828 = vmatprep.subr.bf16.mxu1 %v849_v1  ;;  %v857_v5 = vld [vmem:[#allocation2 + $0x40] sm:$0xff]   ;;  %v858_v10 = vld [vmem:[#allocation2 + $0x8] sm:$0xff]   ;;  %v860_v12 = vld [vmem:[#allocation2 + $0x10] sm:$0xff]   ;;  %p913_p10 = scmp.ne.s32.totalorder %s560_s1, %s912_s21  ;;  %p918_p12 = scmp.lt.s32.totalorder %s912_s21, %s912_s21 }
  0x20   :  { %795 = vmatprep.mubr.bf16.mxu0 %v856_v4  ;;  %811 = vmatprep.mubr.bf16.mxu1 %v857_v5  ;;  %v855_v9 = vld [vmem:[#allocation5] sm:$0xff]   ;;  %v859_v11 = vld [vmem:[#allocation2 + $0x48] sm:$0xff]   ;;  %v861_v13 = vld [vmem:[#allocation2 + $0x50] sm:$0xff]  }
  0x21   :  { %v862_v14 = vld [vmem:[#allocation2 + $0x18] sm:$0xff]   ;;  %v864_v16 = vld [vmem:[#allocation2 + $0x20] sm:$0xff]   ;;  %v866_v18 = vld [vmem:[#allocation2 + $0x28] sm:$0xff]   ;;  %p919_p13 = por %p918_p12, %p917_p11 }
  0x22   :  { %782 = vmatpush3.bf16.msra.mxu0 %v849_v1  ;;  %836 = vmatpush3.bf16.msra.mxu1 %v849_v1  ;;  %v863_v15 = vld [vmem:[#allocation2 + $0x58] sm:$0xff]   ;;  %v865_v17 = vld [vmem:[#allocation2 + $0x60] sm:$0xff]   ;;  %v867_v19 = vld [vmem:[#allocation2 + $0x68] sm:$0xff]  }
  0x23   :  { %783 = vmatprep.subr.bf16.mxu0 %v850_v2  ;;  %829 = vmatprep.subr.bf16.mxu1 %v850_v2  ;;  %v868_v20 = vld [vmem:[#allocation2 + $0x30] sm:$0xff]   ;;  %v870_v22 = vld [vmem:[#allocation2 + $0x38] sm:$0xff]   ;;  %p920_p0 = pnand %p919_p13, %p913_p10 }
  0x24   :  { %v869_v21 = vld [vmem:[#allocation2 + $0x70] sm:$0xff]   ;;  %v871_v23 = vld [vmem:[#allocation2 + $0x78] sm:$0xff]  }
  0x26   :  { %784 = vmatpush3.bf16.msra.mxu0 %v850_v2  ;;  %837 = vmatpush3.bf16.msra.mxu1 %v850_v2 }
  0x27   :  { %785 = vmatprep.subr.bf16.mxu0 %v851_v3  ;;  %830 = vmatprep.subr.bf16.mxu1 %v851_v3 }
  0x2a   :  { %786 = vmatpush3.bf16.msra.mxu0 %v851_v3  ;;  %838 = vmatpush3.bf16.msra.mxu1 %v851_v3 }
  0x2b   :  { %787 = vmatprep.subr.bf16.mxu0 %v852_v6  ;;  %831 = vmatprep.subr.bf16.mxu1 %v852_v6 }
  0x2e   :  { %788 = vmatpush3.bf16.msra.mxu0 %v852_v6  ;;  %839 = vmatpush3.bf16.msra.mxu1 %v852_v6 }
  0x2f   :  { %789 = vmatprep.subr.bf16.mxu0 %v853_v7  ;;  %832 = vmatprep.subr.bf16.mxu1 %v853_v7 }
  0x32   :  { %790 = vmatpush3.bf16.msra.mxu0 %v853_v7  ;;  %840 = vmatpush3.bf16.msra.mxu1 %v853_v7 }
  0x33   :  { %791 = vmatprep.subr.bf16.mxu0 %v854_v8  ;;  %833 = vmatprep.subr.bf16.mxu1 %v854_v8 }
  0x36   :  { %792 = vmatpush3.bf16.msra.mxu0 %v854_v8  ;;  %841 = vmatpush3.bf16.msra.mxu1 %v854_v8 }
  0x37   :  { %793 = vmatprep.subr.bf16.mxu0 %v855_v9  ;;  %834 = vmatprep.subr.bf16.mxu1 %v855_v9 }
  0x3a   :  { %794 = vmatpush3.bf16.msra.mxu0 %v855_v9  ;;  %842 = vmatpush3.bf16.msra.mxu1 %v855_v9 }
  0x3d   :  { %796 = vmatmul.mubr.bf16.vlgmr.msra.gmra.mxu0 %v858_v10  ;;  %812 = vmatmul.mubr.bf16.vlgmr.msra.gmra.mxu1 %v859_v11 }
  0x3e   :  { %799 = vmatprep.mubr.bf16.mxu0 %v860_v12  ;;  %815 = vmatprep.mubr.bf16.mxu1 %v861_v13 }
  0x45   :  { %800 = vmatmul.mubr.bf16.gmra.mxu0 %v862_v14  ;;  %816 = vmatmul.mubr.bf16.gmra.mxu1 %v863_v15 }
  0x46   :  { %803 = vmatprep.mubr.bf16.mxu0 %v864_v16  ;;  %819 = vmatprep.mubr.bf16.mxu1 %v865_v17 }
  0x4d   :  { %804 = vmatmul.mubr.bf16.gmra.mxu0 %v866_v18  ;;  %820 = vmatmul.mubr.bf16.gmra.mxu1 %v867_v19 }
  0x4e   :  { %807 = vmatprep.mubr.bf16.mxu0 %v868_v20  ;;  %823 = vmatprep.mubr.bf16.mxu1 %v869_v21 }
  0x55   :  { %808 = vmatmul.mubr.bf16.gmra.mxu0 %v870_v22  ;;  %824 = vmatmul.mubr.bf16.gmra.mxu1 %v871_v23 }
  0xfd   :  { %v797_v24 = vpop.f32.mrf.mxu0  ;;  %v813_v25 = vpop.f32.mrf.mxu1 }
  0xff   :  { %v267_v26 = vpop.f32.mrf.mxu0  ;;  %v331_v27 = vpop.f32.mrf.mxu1 }
 0x101   :  { %v798_v28 = vpop.f32.mrf.mxu0  ;;  %v814_v29 = vpop.f32.mrf.mxu1 }
 0x102   :  { %v668_v30 = vpack.c.bf16 %v798_v28, %v797_v24  ;;  %v708_v31 = vpack.c.bf16 %v814_v29, %v813_v25 }
 0x103   :  { %v270_v32 = vpop.f32.mrf.mxu0  ;;  %v334_v33 = vpop.f32.mrf.mxu1 }
 0x104   :  { %740 = vst [vmem:[#allocation7 + $0x8] sm:$0xff] %v668_v30   ;;  %748 = vst [vmem:[#allocation7 + $0x48] sm:$0xff] %v708_v31   ;;  %v663_v34 = vpack.c.bf16 %v270_v32, %v267_v26  ;;  %v703_v35 = vpack.c.bf16 %v334_v33, %v331_v27 }
 0x105   :  { %v801_v36 = vpop.f32.mrf.mxu0  ;;  %v817_v37 = vpop.f32.mrf.mxu1 }
 0x106   :  { %664 = vst [vmem:[#allocation7] sm:$0xff] %v663_v34   ;;  %747 = vst [vmem:[#allocation7 + $0x40] sm:$0xff] %v703_v35  }
 0x107   :  { %v283_v38 = vpop.f32.mrf.mxu0  ;;  %v347_v39 = vpop.f32.mrf.mxu1 }
 0x109   :  { %v802_v40 = vpop.f32.mrf.mxu0  ;;  %v818_v41 = vpop.f32.mrf.mxu1 }
 0x10a   :  { %v678_v42 = vpack.c.bf16 %v802_v40, %v801_v36  ;;  %v718_v43 = vpack.c.bf16 %v818_v41, %v817_v37 }
 0x10b   :  { %v286_v44 = vpop.f32.mrf.mxu0  ;;  %v350_v45 = vpop.f32.mrf.mxu1 }
 0x10c   :  { %742 = vst [vmem:[#allocation7 + $0x18] sm:$0xff] %v678_v42   ;;  %750 = vst [vmem:[#allocation7 + $0x58] sm:$0xff] %v718_v43   ;;  %v673_v46 = vpack.c.bf16 %v286_v44, %v283_v38  ;;  %v713_v47 = vpack.c.bf16 %v350_v45, %v347_v39 }
 0x10d   :  { %v805_v48 = vpop.f32.mrf.mxu0  ;;  %v821_v49 = vpop.f32.mrf.mxu1 }
 0x10e   :  { %741 = vst [vmem:[#allocation7 + $0x10] sm:$0xff] %v673_v46   ;;  %749 = vst [vmem:[#allocation7 + $0x50] sm:$0xff] %v713_v47  }
 0x10f   :  { %v299_v50 = vpop.f32.mrf.mxu0  ;;  %v363_v51 = vpop.f32.mrf.mxu1 }
 0x111   :  { %v806_v52 = vpop.f32.mrf.mxu0  ;;  %v822_v53 = vpop.f32.mrf.mxu1 }
 0x112   :  { %v688_v54 = vpack.c.bf16 %v806_v52, %v805_v48  ;;  %v728_v55 = vpack.c.bf16 %v822_v53, %v821_v49 }
 0x113   :  { %v302_v56 = vpop.f32.mrf.mxu0  ;;  %v366_v57 = vpop.f32.mrf.mxu1 }
 0x114   :  { %744 = vst [vmem:[#allocation7 + $0x28] sm:$0xff] %v688_v54   ;;  %752 = vst [vmem:[#allocation7 + $0x68] sm:$0xff] %v728_v55   ;;  %v683_v58 = vpack.c.bf16 %v302_v56, %v299_v50  ;;  %v723_v59 = vpack.c.bf16 %v366_v57, %v363_v51 }
 0x115   :  { %v809_v60 = vpop.f32.mrf.mxu0  ;;  %v825_v61 = vpop.f32.mrf.mxu1 }
 0x116   :  { %743 = vst [vmem:[#allocation7 + $0x20] sm:$0xff] %v683_v58   ;;  %751 = vst [vmem:[#allocation7 + $0x60] sm:$0xff] %v723_v59  }
 0x117   :  { %v315_v62 = vpop.f32.mrf.mxu0  ;;  %v379_v63 = vpop.f32.mrf.mxu1 }
 0x119   :  { %v810_v0 = vpop.f32.mrf.mxu0  ;;  %v826_v1 = vpop.f32.mrf.mxu1 }
 0x11a   :  { %v698_v2 = vpack.c.bf16 %v810_v0, %v809_v60  ;;  %v738_v3 = vpack.c.bf16 %v826_v1, %v825_v61 }
 0x11b   :  { %v318_v4 = vpop.f32.mrf.mxu0  ;;  %v382_v5 = vpop.f32.mrf.mxu1 }
 0x11c   :  { %746 = vst [vmem:[#allocation7 + $0x38] sm:$0xff] %v698_v2   ;;  %754 = vst [vmem:[#allocation7 + $0x78] sm:$0xff] %v738_v3   ;;  %v693_v6 = vpack.c.bf16 %v318_v4, %v315_v62  ;;  %v733_v7 = vpack.c.bf16 %v382_v5, %v379_v63 }
 0x11e   :  { %745 = vst [vmem:[#allocation7 + $0x30] sm:$0xff] %v693_v6   ;;  %753 = vst [vmem:[#allocation7 + $0x70] sm:$0xff] %v733_v7  }
 0x11f   :  { %923 = shalt.err (!%p920_p0)
}
 0x120   :  { %565 = dma.vmem_to_hbm [thread:$0]  %s560_s1, 2048, %s978_s2, [#allocation4], %s939_s12, %s939_s12, %s940_s13  }
 0x121   :  { %936 = dma.done.wait [#allocation4], 2048  }
 0x122   :  { %937 = vsyncadd [#allocation4], 4294965248 }
 0x123   :  { %569 = vsyncpa [#allocation3], 1 }
 0x124   :  { %570 = vsyncpa [#allocation6], 1 }
 0x125   :  { %571 = vsyncpa [#allocation4], 1 }

</bundles_post_ra>
